<compile_context>
chip_gen: v5e
topology: v5e:2x2
jax: 0.10.0
libtpu: 0.0.40
codegen_flags: <defaults>
</compile_context>

<pallas_src>
import math

import jax
import jax.numpy as jnp
from jax import lax
from jax.experimental import pallas as pl
from jax.experimental.pallas import tpu as pltpu

EPS = 1e-5           # torch.nn.LayerNorm default
NEG_INF = -1e30      # causal mask fill (f32-safe)


def _layernorm(z, gamma):
    mu = jnp.mean(z, axis=-1, keepdims=True)
    zc = z - mu
    var = jnp.mean(zc * zc, axis=-1, keepdims=True)
    return zc * lax.rsqrt(var + EPS) * gamma


# --------------------------------------------------------------------------
# Kernel 1: LayerNorm1 + fused QKV projection + xPos rotary.
#   grid (B, S/TS); writes head-major bf16 q/k/v of shape (B, NH, S, D).
# --------------------------------------------------------------------------
def qkv_rope_kernel(x_ref, g1_ref, cq_ref, sq_ref, ck_ref, sk_ref, wqkv_ref,
                    q_ref, k_ref, v_ref):
    _, NH, TS, D = q_ref.shape
    Dv = v_ref.shape[3]
    K = NH * D
    V = NH * Dv

    x = x_ref[0]                                   # (TS, H) f32
    xn = _layernorm(x, g1_ref[...])                # (TS, H) f32

    # fused [Wq | Wk | Wv] matmul: bf16 operands, f32 accumulation
    qkv = jnp.dot(xn.astype(jnp.bfloat16), wqkv_ref[...],
                  preferred_element_type=jnp.float32)     # (TS, 2K+V)

    q3 = qkv[:, :K].reshape(TS, NH, D)
    k3 = qkv[:, K:2 * K].reshape(TS, NH, D)
    v3 = qkv[:, 2 * K:2 * K + V].reshape(TS, NH, Dv)

    # q/k weight columns are permuted even-dims-first per head, so
    # rotate_every_two == rotate-half; the rotation sign, the xPos t / 1/t
    # scales and the 1/sqrt(D) attention scale are folded into the tables.
    # TODO(synk): pltpu.roll(z, D//2, axis=-1) would move this onto the XLU.
    def rot_half(z):
        return jnp.concatenate([z[..., D // 2:], z[..., :D // 2]], axis=-1)

    cq = cq_ref[...][:, None, :]     # (TS, 1, D) broadcast over heads
    sq = sq_ref[...][:, None, :]
    ck = ck_ref[...][:, None, :]
    sk = sk_ref[...][:, None, :]

    q3 = q3 * cq + rot_half(q3) * sq
    k3 = k3 * ck + rot_half(k3) * sk

    # one relayout per seq tile (amortized), so the attention kernel never
    # transposes inside its kv loop.
    q_ref[0] = jnp.swapaxes(q3, 0, 1).astype(q_ref.dtype)
    k_ref[0] = jnp.swapaxes(k3, 0, 1).astype(k_ref.dtype)
    v_ref[0] = jnp.swapaxes(v3, 0, 1).astype(v_ref.dtype)


# --------------------------------------------------------------------------
# Kernel 2: causal flash attention + output projection + residual.
#   grid (B, S/TQ, S/TKV) with TQ == TKV; kv axis is the reduction axis.
# --------------------------------------------------------------------------
def flash_attn_kernel(x_ref, q_ref, k_ref, v_ref, wo_ref, o_ref,
                      m_ref, l_ref, acc_ref):
    qi = pl.program_id(1)
    ki = pl.program_id(2)
    _, NH, TQ, _ = q_ref.shape
    TKV = k_ref.shape[2]
    Dv = v_ref.shape[3]

    @pl.when(ki == 0)
    def _init():
        m_ref[...] = jnp.full(m_ref.shape, -jnp.inf, jnp.float32)
        l_ref[...] = jnp.zeros(l_ref.shape, jnp.float32)
        acc_ref[...] = jnp.zeros(acc_ref.shape, jnp.float32)

    def flash_update(masked):
        # scores; 1/sqrt(D) is already folded into q via the rotary tables
        s = jnp.einsum('hqd,hkd->hqk', q_ref[0], k_ref[0],
                       preferred_element_type=jnp.float32)      # (NH,TQ,TKV)
        if masked:   # only the diagonal block needs a mask (TQ == TKV)
            rows = lax.broadcasted_iota(jnp.int32, (TQ, TKV), 0)
            cols = lax.broadcasted_iota(jnp.int32, (TQ, TKV), 1)
            s = jnp.where((cols <= rows)[None], s, NEG_INF)
        m_prev = m_ref[...]
        m_new = jnp.maximum(m_prev, jnp.max(s, axis=-1, keepdims=True))
        alpha = jnp.exp(m_prev - m_new)
        p = jnp.exp(s - m_new)                                   # unnormalized
        l_ref[...] = alpha * l_ref[...] + jnp.sum(p, axis=-1, keepdims=True)
        acc_ref[...] = alpha * acc_ref[...] + jnp.einsum(
            'hqk,hkd->hqd', p.astype(jnp.bfloat16), v_ref[0],
            preferred_element_type=jnp.float32)
        m_ref[...] = m_new

    @pl.when(ki < qi)          # strictly below the causal diagonal: no mask
    def _below():
        flash_update(masked=False)

    @pl.when(ki == qi)         # diagonal block: mask, then finalize this q tile
    def _diag_and_finalize():
        flash_update(masked=True)
        # normalize once after PV: O(NH*TQ*Dv) instead of O(NH*TQ*TKV)
        ctx = acc_ref[...] * pl.reciprocal(l_ref[...], approx=True)
        attn = jnp.swapaxes(ctx, 0, 1).reshape(TQ, NH * Dv)
        o_ref[0] = x_ref[0] + jnp.dot(attn.astype(jnp.bfloat16), wo_ref[...],
                                      preferred_element_type=jnp.float32)
    # kv blocks with ki > qi are skipped entirely; their k/v DMA indices are
    # clamped to the diagonal block by the index_maps, so nothing new is fetched.


# --------------------------------------------------------------------------
# Kernel 3: LayerNorm2 + F-chunked MLP (GELU) + residual.
#   grid (B, S/TS, F/TF); F axis is the reduction axis.
# --------------------------------------------------------------------------
def mlp_kernel(x1_ref, g2_ref, w1_ref, w2_ref, o_ref, xn_ref, acc_ref):
    fi = pl.program_id(2)

    @pl.when(fi == 0)
    def _init():
        x1 = x1_ref[0]
        xn_ref[...] = _layernorm(x1, g2_ref[...]).astype(xn_ref.dtype)
        acc_ref[...] = x1                       # residual accumulates in f32

    h = jnp.dot(xn_ref[...], w1_ref[...], preferred_element_type=jnp.float32)
    h = jax.nn.gelu(h, approximate=False)       # torch.nn.GELU() (exact / erf)
    acc_ref[...] += jnp.dot(h.astype(jnp.bfloat16), w2_ref[...],
                            preferred_element_type=jnp.float32)

    @pl.when(fi == pl.num_programs(2) - 1)
    def _finalize():
        o_ref[0] = acc_ref[...].astype(o_ref.dtype)


# --------------------------------------------------------------------------
# Wrapper / glue
# --------------------------------------------------------------------------
def _tpu_vmem_capacity_bytes():
    try:
        return int(pltpu.get_tpu_info().vmem_capacity_bytes)
    except Exception:
        return 128 * 1024 * 1024


def transformer_block_forward(x, g1, wq, wk, wv, wo, g2, w1, w2,
                              c, s, t, invt, n_heads, head_dim,
                              seq_tile=None, f_tile=None):
    B, S, H = x.shape
    K = wq.shape[0]   # key_size
    V = wv.shape[0]   # value_size
    F = w1.shape[0]
    D = head_dim
    NH = n_heads
    # torch's unflatten(-1, (n_heads, hidden//n_heads)) implies:
    assert K == NH * D and V == NH * D and D % 2 == 0

    # generation-aware VMEM budget and default tile sizes (v7x: 64 MiB physical)
    cap = _tpu_vmem_capacity_bytes()
    vmem_limit = int(min(0.6 * cap, 64 * 1024 * 1024))
    if seq_tile is None:
        seq_tile = 256 if cap > 64 * 1024 * 1024 else 128
    if f_tile is None:
        f_tile = 512

    TS = min(seq_tile, S)
    TF = min(f_tile, F)
    # TODO(synk): pad / ragged handling when S % TS != 0 or F % TF != 0.
    assert S % TS == 0 and F % TF == 0
    nS, nF = S // TS, F // TF

    # ---- one-time parameter / table prep (init-time work in a real model) ----
    # per-head even-dims-first permutation turns rotate_every_two into a
    # rotate-half; q.k scores are invariant because q and k share the perm.
    perm_d = jnp.concatenate([jnp.arange(0, D, 2), jnp.arange(1, D, 2)])
    perm_k = (jnp.arange(NH)[:, None] * D + perm_d[None, :]).reshape(-1)

    wqkv = jnp.concatenate([wq.T[:, perm_k], wk.T[:, perm_k], wv.T],
                           axis=1).astype(jnp.bfloat16)          # (H, 2K+V)
    wo_t = wo.T.astype(jnp.bfloat16)                             # (V, H)
    w1_t = w1.T.astype(jnp.bfloat16)                             # (H, F)
    w2_t = w2.T.astype(jnp.bfloat16)                             # (F, H)

    sign = jnp.concatenate([-jnp.ones((D // 2,), jnp.float32),
                            jnp.ones((D // 2,), jnp.float32)])[None]
    scale = 1.0 / math.sqrt(D)
    c_p, s_p, t_p, it_p = (a[:, perm_d] for a in (c, s, t, invt))
    cq = c_p * t_p * scale          # cos * t * 1/sqrt(D)
    sq = s_p * sign * t_p * scale   # sin * rotation sign * t * 1/sqrt(D)
    ck = c_p * it_p                 # cos / t
    sk = s_p * sign * it_p          # sin * rotation sign / t

    vmem_full = pl.BlockSpec(memory_space=pltpu.MemorySpace.VMEM)

    # -------- stage 1: LN1 + fused QKV + rotary -> head-major bf16 q/k/v --------
    q_hb, k_hb, v_hb = pl.pallas_call(
        qkv_rope_kernel,
        out_shape=(
            jax.ShapeDtypeStruct((B, NH, S, D), jnp.bfloat16),
            jax.ShapeDtypeStruct((B, NH, S, D), jnp.bfloat16),
            jax.ShapeDtypeStruct((B, NH, S, D), jnp.bfloat16),
        ),
        grid=(B, nS),
        in_specs=[
            pl.BlockSpec((1, TS, H), lambda b, i: (b, i, 0)),    # x
            vmem_full,                                            # g1 (single copy)
            pl.BlockSpec((TS, D), lambda b, i: (i, 0)),           # cq
            pl.BlockSpec((TS, D), lambda b, i: (i, 0)),           # sq
            pl.BlockSpec((TS, D), lambda b, i: (i, 0)),           # ck
            pl.BlockSpec((TS, D), lambda b, i: (i, 0)),           # sk
            # TODO(synk): for very large H the fused QKV weight should be
            # column-chunked like the MLP rather than fully VMEM-resident.
            vmem_full,                                            # wqkv (single copy)
        ],
        out_specs=(
            pl.BlockSpec((1, NH, TS, D), lambda b, i: (b, 0, i, 0)),
            pl.BlockSpec((1, NH, TS, D), lambda b, i: (b, 0, i, 0)),
            pl.BlockSpec((1, NH, TS, D), lambda b, i: (b, 0, i, 0)),
        ),
        compiler_params=pltpu.CompilerParams(
            dimension_semantics=("parallel", "parallel"),
            vmem_limit_bytes=vmem_limit),
    )(x, g1.reshape(1, H), cq, sq, ck, sk, wqkv)

    # -------- stage 2: flash attention + Wo + residual --------
    x1 = pl.pallas_call(
        flash_attn_kernel,
        out_shape=jax.ShapeDtypeStruct((B, S, H), jnp.float32),
        grid=(B, nS, nS),
        in_specs=[
            pl.BlockSpec((1, TS, H), lambda b, qi, ki: (b, qi, 0)),          # x
            pl.BlockSpec((1, NH, TS, D), lambda b, qi, ki: (b, 0, qi, 0)),   # q
            pl.BlockSpec((1, NH, TS, D),
                         lambda b, qi, ki: (b, 0, jnp.minimum(ki, qi), 0)),  # k
            pl.BlockSpec((1, NH, TS, D),
                         lambda b, qi, ki: (b, 0, jnp.minimum(ki, qi), 0)),  # v
            vmem_full,                                                        # wo
        ],
        out_specs=pl.BlockSpec((1, TS, H), lambda b, qi, ki: (b, qi, 0)),
        scratch_shapes=[
            pltpu.VMEM((NH, TS, 1), jnp.float32),   # running max m
            pltpu.VMEM((NH, TS, 1), jnp.float32),   # running denom l
            pltpu.VMEM((NH, TS, D), jnp.float32),   # unnormalized context acc
        ],
        compiler_params=pltpu.CompilerParams(
            dimension_semantics=("parallel", "parallel", "arbitrary"),
            vmem_limit_bytes=vmem_limit),
    )(x, q_hb, k_hb, v_hb, wo_t)

    # -------- stage 3: LN2 + F-chunked MLP + residual --------
    out = pl.pallas_call(
        mlp_kernel,
        out_shape=jax.ShapeDtypeStruct((B, S, H), x.dtype),
        grid=(B, nS, nF),
        in_specs=[
            pl.BlockSpec((1, TS, H), lambda b, i, f: (b, i, 0)),   # x1
            vmem_full,                                              # g2
            pl.BlockSpec((H, TF), lambda b, i, f: (0, f)),          # w1 tile
            pl.BlockSpec((TF, H), lambda b, i, f: (f, 0)),          # w2 tile
        ],
        out_specs=pl.BlockSpec((1, TS, H), lambda b, i, f: (b, i, 0)),
        scratch_shapes=[
            pltpu.VMEM((TS, H), jnp.bfloat16),   # LN2(x1), cached across F chunks
            pltpu.VMEM((TS, H), jnp.float32),    # residual + MLP accumulator
        ],
        compiler_params=pltpu.CompilerParams(
            dimension_semantics=("parallel", "parallel", "arbitrary"),
            vmem_limit_bytes=vmem_limit),
    )(x1, g2.reshape(1, H), w1_t, w2_t)

    return out


# --------------------------------------------------------------------------
# xpos tables (precomputed buffers in torch's __init__) — plain-JAX glue.
# --------------------------------------------------------------------------
def xpos_tables(head_dim, max_seq, start, seq_len):
    theta_base = 10000.0
    alpha = 0.4 * head_dim
    drange = jnp.arange(2, head_dim + 2, 2, dtype=jnp.float32)              # (D/2,)
    theta = jnp.repeat((1.0 / theta_base) ** (drange / head_dim), 2)        # (D,)
    zeta = jnp.repeat((drange / (head_dim / 2) + alpha) / (1 + alpha), 2)   # (D,)
    half = max_seq // 2
    seq_range = (jnp.arange(-half, max_seq - half, dtype=jnp.float32) / 512.0)[:, None]
    c = jnp.cos(seq_range * theta[None, :])       # (max_seq, D)
    s = jnp.sin(seq_range * theta[None, :])
    t = zeta[None, :] ** seq_range
    invt = 1.0 / t
    end = start + seq_len
    return c[start:end], s[start:end], t[start:end], invt[start:end]


# --------------------------------------------------------------------------
# Pure-JAX f32 reference (mirrors the PyTorch forward, eval, kv_cache=None)
# --------------------------------------------------------------------------
def reference_forward(x, g1, wq, wk, wv, wo, g2, w1, w2,
                      c, s, t, invt, n_heads, head_dim):
    def ln(z, g):
        mu = z.mean(-1, keepdims=True)
        var = ((z - mu) ** 2).mean(-1, keepdims=True)
        return (z - mu) / jnp.sqrt(var + EPS) * g

    B, S, H = x.shape
    xn = ln(x, g1)
    q = (xn @ wq.T).reshape(B, S, n_heads, head_dim)
    k = (xn @ wk.T).reshape(B, S, n_heads, head_dim)
    v = (xn @ wv.T).reshape(B, S, n_heads, head_dim)

    def rot2(z):
        zp = z.reshape(z.shape[:-1] + (head_dim // 2, 2))
        r = jnp.stack([-zp[..., 1], zp[..., 0]], axis=-1)
        return r.reshape(z.shape)

    cb = c[None, :, None, :]
    sb = s[None, :, None, :]
    tb = t[None, :, None, :]
    ib = invt[None, :, None, :]
    q = (q * cb + rot2(q) * sb) * tb
    k = (k * cb + rot2(k) * sb) * ib

    qh = q.transpose(0, 2, 1, 3)
    kh = k.transpose(0, 2, 1, 3)
    vh = v.transpose(0, 2, 1, 3)
    scores = jnp.einsum("bhqd,bhkd->bhqk", qh, kh) / math.sqrt(head_dim)
    mask = jnp.tril(jnp.ones((S, S), bool))
    scores = jnp.where(mask, scores, -jnp.inf)
    p = jax.nn.softmax(scores, axis=-1)
    attn = jnp.einsum("bhqk,bhkd->bhqd", p, vh).transpose(0, 2, 1, 3).reshape(B, S, -1)

    x1 = x + attn @ wo.T
    xn2 = ln(x1, g2)
    h = jax.nn.gelu(xn2 @ w1.T, approximate=False)
    return x1 + h @ w2.T


# --------------------------------------------------------------------------
if __name__ == "__main__":
    # small config: hidden=32, 4 heads (head_dim=8), key_size=value_size=32,
    # seq=8, batch=2, max_sequence_length=16, 2 blocks in the network.
    B, S, H, NH = 2, 8, 32, 4
    D = H // NH
    KSZ = VSZ = H
    MAX_SEQ = 16
    N_LAYERS = 2
    INDEX = 0  # kv_cache is None -> prefill with causal mask

    key = jax.random.PRNGKey(0)
    ks = jax.random.split(key, 8)
    x = jax.random.normal(ks[0], (B, S, H), jnp.float32)

    wq = 0.02 * jax.random.normal(ks[1], (KSZ, H), jnp.float32)
    wk = 0.02 * jax.random.normal(ks[2], (KSZ, H), jnp.float32)
    wv = 0.02 * jax.random.normal(ks[3], (VSZ, H), jnp.float32)
    wo = (0.02 / math.sqrt(N_LAYERS)) * jax.random.normal(ks[4], (H, VSZ), jnp.float32)
    w1 = 0.02 * jax.random.normal(ks[5], (4 * H, H), jnp.float32)
    w2 = (0.02 / math.sqrt(N_LAYERS)) * jax.random.normal(ks[6], (H, 4 * H), jnp.float32)
    g1 = jnp.ones((H,), jnp.float32)  # LayerNorm weights (bias=False)
    g2 = jnp.ones((H,), jnp.float32)

    c, s, t, invt = xpos_tables(D, MAX_SEQ, INDEX, S)

    out = transformer_block_forward(
        x, g1, wq, wk, wv, wo, g2, w1, w2, c, s, t, invt, NH, D
    )
    out = jax.block_until_ready(out)

    ref = reference_forward(x, g1, wq, wk, wv, wo, g2, w1, w2, c, s, t, invt, NH, D)
    assert out.shape == (B, S, H)
    err = float(jnp.max(jnp.abs(out - ref)))
    # bf16 matmul operands / bf16 q,k,v staging vs. pure-f32 reference.
    assert err < 2e-2, err

    # TODO(synk): kv_cache update path (get_full_kv) and training-mode dropout
    # are not implemented; forward runs the kv_cache=None eval path only.
    print("KERNEL_OK")
</pallas_src>

<mosaic_0001>
module attributes {stable_mosaic.version = 11 : i64} {
  func.func @qkv_rope_kernel(%arg0: i32, %arg1: i32, %arg2: memref<1x8x32xf32, #tpu.memory_space<vmem>>, %arg3: memref<1x32xf32, #tpu.memory_space<vmem>>, %arg4: memref<8x8xf32, #tpu.memory_space<vmem>>, %arg5: memref<8x8xf32, #tpu.memory_space<vmem>>, %arg6: memref<8x8xf32, #tpu.memory_space<vmem>>, %arg7: memref<8x8xf32, #tpu.memory_space<vmem>>, %arg8: memref<32x96xbf16, #tpu.memory_space<vmem>>, %arg9: memref<1x4x8x8xbf16, #tpu.memory_space<vmem>>, %arg10: memref<1x4x8x8xbf16, #tpu.memory_space<vmem>>, %arg11: memref<1x4x8x8xbf16, #tpu.memory_space<vmem>>) attributes {dimension_semantics = [#tpu.dimension_semantics<parallel>, #tpu.dimension_semantics<parallel>], iteration_bounds = array<i64: 2, 1>, scalar_prefetch = 0 : i64, scratch_operands = 0 : i64, tpu.core_type = #tpu.core_type<tc>, window_params = [{transform_indices = @transform_0, window_bounds = array<i64: 1, 8, 32>}, {pipeline_mode = #tpu.pipeline_mode<synchronous>, transform_indices = @transform_1, window_bounds = array<i64: 1, 32>}, {transform_indices = @transform_2, window_bounds = array<i64: 8, 8>}, {transform_indices = @transform_3, window_bounds = array<i64: 8, 8>}, {transform_indices = @transform_4, window_bounds = array<i64: 8, 8>}, {transform_indices = @transform_5, window_bounds = array<i64: 8, 8>}, {pipeline_mode = #tpu.pipeline_mode<synchronous>, transform_indices = @transform_6, window_bounds = array<i64: 32, 96>}, {transform_indices = @transform_7, window_bounds = array<i64: 1, 4, 8, 8>}, {transform_indices = @transform_8, window_bounds = array<i64: 1, 4, 8, 8>}, {transform_indices = @transform_9, window_bounds = array<i64: 1, 4, 8, 8>}]} {
    %c0 = arith.constant 0 : index
    %c0_0 = arith.constant 0 : index
    %c0_1 = arith.constant 0 : index
    %0 = vector.load %arg2[%c0, %c0_0, %c0_1] : memref<1x8x32xf32, #tpu.memory_space<vmem>>, vector<1x8x32xf32>
    %1 = vector.shape_cast %0 : vector<1x8x32xf32> to vector<8x32xf32>
    %c0_2 = arith.constant 0 : index
    %c0_3 = arith.constant 0 : index
    %2 = vector.load %arg3[%c0_2, %c0_3] : memref<1x32xf32, #tpu.memory_space<vmem>>, vector<1x32xf32>
    %cst = arith.constant dense<0.000000e+00> : vector<8xf32>
    %3 = vector.multi_reduction <add>, %1, %cst [1] : vector<8x32xf32> to vector<8xf32>
    %4 = vector.shape_cast %3 : vector<8xf32> to vector<8x1xf32>
    %cst_4 = arith.constant 3.200000e+01 : f32
    %5 = vector.broadcast %cst_4 : f32 to vector<8x1xf32>
    %6 = arith.divf %4, %5 : vector<8x1xf32>
    %7 = vector.broadcast %6 : vector<8x1xf32> to vector<8x32xf32>
    %8 = arith.subf %1, %7 : vector<8x32xf32>
    %9 = arith.mulf %8, %8 : vector<8x32xf32>
    %cst_5 = arith.constant dense<0.000000e+00> : vector<8xf32>
    %10 = vector.multi_reduction <add>, %9, %cst_5 [1] : vector<8x32xf32> to vector<8xf32>
    %11 = vector.shape_cast %10 : vector<8xf32> to vector<8x1xf32>
    %cst_6 = arith.constant 3.200000e+01 : f32
    %12 = vector.broadcast %cst_6 : f32 to vector<8x1xf32>
    %13 = arith.divf %11, %12 : vector<8x1xf32>
    %cst_7 = arith.constant 9.99999974E-6 : f32
    %14 = vector.broadcast %cst_7 : f32 to vector<8x1xf32>
    %15 = arith.addf %13, %14 : vector<8x1xf32>
    %16 = math.rsqrt %15 : vector<8x1xf32>
    %17 = vector.broadcast %16 : vector<8x1xf32> to vector<8x32xf32>
    %18 = arith.mulf %8, %17 : vector<8x32xf32>
    %19 = vector.broadcast %2 : vector<1x32xf32> to vector<8x32xf32>
    %20 = arith.mulf %18, %19 : vector<8x32xf32>
    %21 = arith.truncf %20 : vector<8x32xf32> to vector<8x32xbf16>
    %c0_8 = arith.constant 0 : index
    %c0_9 = arith.constant 0 : index
    %22 = vector.load %arg8[%c0_8, %c0_9] : memref<32x96xbf16, #tpu.memory_space<vmem>>, vector<32x96xbf16>
    %cst_10 = arith.constant dense<0.000000e+00> : vector<8x96xf32>
    %23 = tpu.matmul %21, %22, %cst_10 {dimension_numbers = #tpu.dot_dimension_numbers<[1], [0], [0], [1], [0, 0, 1, 1], [], []>} : vector<8x32xbf16>, vector<32x96xbf16>, vector<8x96xf32> -> vector<8x96xf32>
    %24 = vector.extract_strided_slice %23 {offsets = [0, 0], sizes = [8, 32], strides = [1, 1]} : vector<8x96xf32> to vector<8x32xf32>
    %25 = vector.shape_cast %24 : vector<8x32xf32> to vector<8x4x8xf32>
    %26 = vector.extract_strided_slice %23 {offsets = [0, 32], sizes = [8, 32], strides = [1, 1]} : vector<8x96xf32> to vector<8x32xf32>
    %27 = vector.shape_cast %26 : vector<8x32xf32> to vector<8x4x8xf32>
    %28 = vector.extract_strided_slice %23 {offsets = [0, 64], sizes = [8, 32], strides = [1, 1]} : vector<8x96xf32> to vector<8x32xf32>
    %29 = vector.shape_cast %28 : vector<8x32xf32> to vector<8x4x8xf32>
    %c0_11 = arith.constant 0 : index
    %c0_12 = arith.constant 0 : index
    %30 = vector.load %arg4[%c0_11, %c0_12] : memref<8x8xf32, #tpu.memory_space<vmem>>, vector<8x8xf32>
    %31 = vector.shape_cast %30 : vector<8x8xf32> to vector<8x1x8xf32>
    %c0_13 = arith.constant 0 : index
    %c0_14 = arith.constant 0 : index
    %32 = vector.load %arg5[%c0_13, %c0_14] : memref<8x8xf32, #tpu.memory_space<vmem>>, vector<8x8xf32>
    %33 = vector.shape_cast %32 : vector<8x8xf32> to vector<8x1x8xf32>
    %c0_15 = arith.constant 0 : index
    %c0_16 = arith.constant 0 : index
    %34 = vector.load %arg6[%c0_15, %c0_16] : memref<8x8xf32, #tpu.memory_space<vmem>>, vector<8x8xf32>
    %35 = vector.shape_cast %34 : vector<8x8xf32> to vector<8x1x8xf32>
    %c0_17 = arith.constant 0 : index
    %c0_18 = arith.constant 0 : index
    %36 = vector.load %arg7[%c0_17, %c0_18] : memref<8x8xf32, #tpu.memory_space<vmem>>, vector<8x8xf32>
    %37 = vector.shape_cast %36 : vector<8x8xf32> to vector<8x1x8xf32>
    %38 = vector.broadcast %31 : vector<8x1x8xf32> to vector<8x4x8xf32>
    %39 = arith.mulf %25, %38 : vector<8x4x8xf32>
    %40 = vector.extract_strided_slice %25 {offsets = [0, 0, 4], sizes = [8, 4, 4], strides = [1, 1, 1]} : vector<8x4x8xf32> to vector<8x4x4xf32>
    %41 = vector.extract_strided_slice %25 {offsets = [0, 0, 0], sizes = [8, 4, 4], strides = [1, 1, 1]} : vector<8x4x8xf32> to vector<8x4x4xf32>
    %42 = tpu.concatenate %40, %41 in 2 : vector<8x4x4xf32>, vector<8x4x4xf32> -> vector<8x4x8xf32>
    %43 = vector.broadcast %33 : vector<8x1x8xf32> to vector<8x4x8xf32>
    %44 = arith.mulf %42, %43 : vector<8x4x8xf32>
    %45 = arith.addf %39, %44 : vector<8x4x8xf32>
    %46 = vector.broadcast %35 : vector<8x1x8xf32> to vector<8x4x8xf32>
    %47 = arith.mulf %27, %46 : vector<8x4x8xf32>
    %48 = vector.extract_strided_slice %27 {offsets = [0, 0, 4], sizes = [8, 4, 4], strides = [1, 1, 1]} : vector<8x4x8xf32> to vector<8x4x4xf32>
    %49 = vector.extract_strided_slice %27 {offsets = [0, 0, 0], sizes = [8, 4, 4], strides = [1, 1, 1]} : vector<8x4x8xf32> to vector<8x4x4xf32>
    %50 = tpu.concatenate %48, %49 in 2 : vector<8x4x4xf32>, vector<8x4x4xf32> -> vector<8x4x8xf32>
    %51 = vector.broadcast %37 : vector<8x1x8xf32> to vector<8x4x8xf32>
    %52 = arith.mulf %50, %51 : vector<8x4x8xf32>
    %53 = arith.addf %47, %52 : vector<8x4x8xf32>
    %54 = tpu.transpose %45, [1, 0, 2] : vector<8x4x8xf32> -> vector<4x8x8xf32>
    %55 = arith.truncf %54 : vector<4x8x8xf32> to vector<4x8x8xbf16>
    %c0_19 = arith.constant 0 : index
    %c0_20 = arith.constant 0 : index
    %c0_21 = arith.constant 0 : index
    %c0_22 = arith.constant 0 : index
    %56 = vector.load %arg9[%c0_19, %c0_20, %c0_21, %c0_22] : memref<1x4x8x8xbf16, #tpu.memory_space<vmem>>, vector<1x4x8x8xbf16>
    %57 = vector.shape_cast %56 : vector<1x4x8x8xbf16> to vector<4x8x8xbf16>
    %58 = vector.shape_cast %55 : vector<4x8x8xbf16> to vector<1x4x8x8xbf16>
    tpu.vector_store %arg9[%c0_19, %c0_20, %c0_21, %c0_22], %58 {strides = array<i32>} : memref<1x4x8x8xbf16, #tpu.memory_space<vmem>>, vector<1x4x8x8xbf16>,
    %59 = tpu.transpose %53, [1, 0, 2] : vector<8x4x8xf32> -> vector<4x8x8xf32>
    %60 = arith.truncf %59 : vector<4x8x8xf32> to vector<4x8x8xbf16>
    %c0_23 = arith.constant 0 : index
    %c0_24 = arith.constant 0 : index
    %c0_25 = arith.constant 0 : index
    %c0_26 = arith.constant 0 : index
    %61 = vector.load %arg10[%c0_23, %c0_24, %c0_25, %c0_26] : memref<1x4x8x8xbf16, #tpu.memory_space<vmem>>, vector<1x4x8x8xbf16>
    %62 = vector.shape_cast %61 : vector<1x4x8x8xbf16> to vector<4x8x8xbf16>
    %63 = vector.shape_cast %60 : vector<4x8x8xbf16> to vector<1x4x8x8xbf16>
    tpu.vector_store %arg10[%c0_23, %c0_24, %c0_25, %c0_26], %63 {strides = array<i32>} : memref<1x4x8x8xbf16, #tpu.memory_space<vmem>>, vector<1x4x8x8xbf16>,
    %64 = tpu.transpose %29, [1, 0, 2] : vector<8x4x8xf32> -> vector<4x8x8xf32>
    %65 = arith.truncf %64 : vector<4x8x8xf32> to vector<4x8x8xbf16>
    %c0_27 = arith.constant 0 : index
    %c0_28 = arith.constant 0 : index
    %c0_29 = arith.constant 0 : index
    %c0_30 = arith.constant 0 : index
    %66 = vector.load %arg11[%c0_27, %c0_28, %c0_29, %c0_30] : memref<1x4x8x8xbf16, #tpu.memory_space<vmem>>, vector<1x4x8x8xbf16>
    %67 = vector.shape_cast %66 : vector<1x4x8x8xbf16> to vector<4x8x8xbf16>
    %68 = vector.shape_cast %65 : vector<4x8x8xbf16> to vector<1x4x8x8xbf16>
    tpu.vector_store %arg11[%c0_27, %c0_28, %c0_29, %c0_30], %68 {strides = array<i32>} : memref<1x4x8x8xbf16, #tpu.memory_space<vmem>>, vector<1x4x8x8xbf16>,
    return
  }
  func.func @transform_0(%arg0: i32, %arg1: i32) -> (i32, i32, i32) {
    %c0_i32 = arith.constant 0 : i32
    %c0_i32_0 = arith.constant 0 : i32
    return %arg0, %arg1, %c0_i32 : i32, i32, i32
  }
  func.func @transform_1(%arg0: i32, %arg1: i32) -> (i32, i32) {
    %c0_i32 = arith.constant 0 : i32
    %c0_i32_0 = arith.constant 0 : i32
    %c0_i32_1 = arith.constant 0 : i32
    return %c0_i32, %c0_i32_0 : i32, i32
  }
  func.func @transform_2(%arg0: i32, %arg1: i32) -> (i32, i32) {
    %c0_i32 = arith.constant 0 : i32
    %c0_i32_0 = arith.constant 0 : i32
    return %arg1, %c0_i32 : i32, i32
  }
  func.func @transform_3(%arg0: i32, %arg1: i32) -> (i32, i32) {
    %c0_i32 = arith.constant 0 : i32
    %c0_i32_0 = arith.constant 0 : i32
    return %arg1, %c0_i32 : i32, i32
  }
  func.func @transform_4(%arg0: i32, %arg1: i32) -> (i32, i32) {
    %c0_i32 = arith.constant 0 : i32
    %c0_i32_0 = arith.constant 0 : i32
    return %arg1, %c0_i32 : i32, i32
  }
  func.func @transform_5(%arg0: i32, %arg1: i32) -> (i32, i32) {
    %c0_i32 = arith.constant 0 : i32
    %c0_i32_0 = arith.constant 0 : i32
    return %arg1, %c0_i32 : i32, i32
  }
  func.func @transform_6(%arg0: i32, %arg1: i32) -> (i32, i32) {
    %c0_i32 = arith.constant 0 : i32
    %c0_i32_0 = arith.constant 0 : i32
    %c0_i32_1 = arith.constant 0 : i32
    return %c0_i32, %c0_i32_0 : i32, i32
  }
  func.func @transform_7(%arg0: i32, %arg1: i32) -> (i32, i32, i32, i32) {
    %c0_i32 = arith.constant 0 : i32
    %c0_i32_0 = arith.constant 0 : i32
    %c0_i32_1 = arith.constant 0 : i32
    return %arg0, %c0_i32, %arg1, %c0_i32_0 : i32, i32, i32, i32
  }
  func.func @transform_8(%arg0: i32, %arg1: i32) -> (i32, i32, i32, i32) {
    %c0_i32 = arith.constant 0 : i32
    %c0_i32_0 = arith.constant 0 : i32
    %c0_i32_1 = arith.constant 0 : i32
    return %arg0, %c0_i32, %arg1, %c0_i32_0 : i32, i32, i32, i32
  }
  func.func @transform_9(%arg0: i32, %arg1: i32) -> (i32, i32, i32, i32) {
    %c0_i32 = arith.constant 0 : i32
    %c0_i32_0 = arith.constant 0 : i32
    %c0_i32_1 = arith.constant 0 : i32
    return %arg0, %c0_i32, %arg1, %c0_i32_0 : i32, i32, i32, i32
  }
}

</mosaic_0001>

<bundles_post_ra>
// kernel: tpu_custom_call.1
= control target key start
LH: loop header
LB: loop body
LE: loop exit
PB: predicated region body
PF: predicated region fallthrough
CT: control target
= control target key end

     0   :  { %s2782_s0 = inlined_call_operand.hbm [shape: f32[2,8,32], index: 0, kind: input, shape index: {}]   ;;  %s2783_s1 = inlined_call_operand.hbm [shape: f32[1,32], index: 1, kind: input, shape index: {}]   ;;  %s2784_s2 = inlined_call_operand.hbm [shape: f32[8,8], index: 2, kind: input, shape index: {}]   ;;  %s2785_s3 = inlined_call_operand.hbm [shape: f32[8,8], index: 3, kind: input, shape index: {}]   ;;  %s2786_s4 = inlined_call_operand.hbm [shape: f32[8,8], index: 4, kind: input, shape index: {}]   ;;  %s2787_s5 = inlined_call_operand.hbm [shape: f32[8,8], index: 5, kind: input, shape index: {}]   ;;  %s2788_s6 = inlined_call_operand.hbm [shape: bf16[32,96], index: 6, kind: input, shape index: {}]   ;;  %s2789_s7 = inlined_call_operand.hbm [shape: bf16[2,4,8,8], index: 7, kind: output, shape index: {0}]   ;;  %s2790_s8 = inlined_call_operand.hbm [shape: bf16[2,4,8,8], index: 8, kind: output, shape index: {1}]   ;;  %s2791_s9 = inlined_call_operand.hbm [shape: bf16[2,4,8,8], index: 9, kind: output, shape index: {2}]  }
   0x1   :  { %2799 = sst [smem:[#allocation25_spill]] %s2782_s0 }
   0x2   :  { %2800 = sst [smem:[#allocation26_spill]] %s2783_s1 }
   0x3   :  { %2801 = sst [smem:[#allocation27_spill]] %s2784_s2 }
   0x4   :  { %2802 = sst [smem:[#allocation28_spill]] %s2785_s3 }
   0x5   :  { %2803 = sst [smem:[#allocation29_spill]] %s2786_s4 }
   0x6   :  { %2804 = sst [smem:[#allocation30_spill]] %s2787_s5 }
   0x7   :  { %15 = vsyncpa [#allocation3], 0 }
   0x8   :  { %17 = vsyncpa [#allocation3 + $0x1], 0 }
   0x9   :  { %18 = vsyncpa [#allocation6], 0 }
   0xa   :  { %19 = vsyncpa [#allocation9], 0 }
   0xb   :  { %20 = vsyncpa [#allocation12], 0 }
   0xc   :  { %21 = vsyncpa [#allocation4], 0 }
   0xd   :  { %23 = vsyncpa [#allocation4 + $0x1], 0 }
   0xe   :  { %24 = vsyncpa [#allocation16], 0 }
   0xf   :  { %26 = vsyncpa [#allocation16 + $0x1], 0  ;;  %s2168_s30 = smov 0   ;;  %s2170_s10 = smov 0  }
  0x10   :  { %s2172_s11 = smov 0   ;;  %s2174_s12 = smov 0  }
  0x11   :  { %s2176_s13 = smov 0   ;;  %s2178_s14 = smov 0  }
  0x12 LB: > { %s2199_s15 = sadd.s32 4294967295, %s2098_s14   ;;  %p1528_p0 = scmp.ge.s32.totalorder %s2098_s14, 1  ;;  %s2098_s14 = sphi %s2178_s14, %s32_s14   ;;  %s2094_s13 = sphi %s2176_s13, %s2828_s13   ;;  %s2090_s12 = sphi %s2174_s12, %s2827_s12   ;;  %s2086_s11 = sphi %s2172_s11, %s2826_s11   ;;  %s2082_s10 = sphi %s2170_s10, %s2825_s10   ;;  %s2078_s30 = sphi %s2168_s30, %s2824_s30  }
  0x13   : > { %p67_p1 = scmp.eq.s32.totalorder %s2199_s15, 0  ;;  %p307_p2 = scmp.lt.s32.totalorder %s2098_s14, 3 }
  0x14   : > { %s2805_s1 = sld [smem:[#allocation26_spill]]  ;;  %p1535_p4 = scmp.ge.s32.totalorder %s2098_s14, 2 }
  0x15   : > { %p2207_p3 = pnand %p1528_p0, %p307_p2  ;;  %s2100_s20 = smov [#allocation5]  }
  0x16   : > { %s321_s21 = sshll.u32 %s2100_s20, 4  ;;  %s2807_s3 = sld [smem:[#allocation28_spill]]  ;;  %s322_s21 = int_to_ptr.vmem [resolvable:$true] %s321_s21 }
  0x17   : > { %p1606_p5 = pneg %p2207_p3  ;;  %s2809_s5 = sld [smem:[#allocation30_spill]] }
  0x18   : > { %s2101_s29 = smov [#allocation8]   ;;  %s2810_s2 = sld [smem:[#allocation27_spill]] }
  0x19   : > { %p2219_p6 = pnand %p1606_p5, %p67_p1  ;;  %s349_s16 = sshll.u32 %s2101_s29, 4  ;;  %s350_s16 = int_to_ptr.vmem [resolvable:$true] %s349_s16 }
  0x1a   : > { %s319_s18 = sshll.u32 %s2805_s1, 4  ;;  %s2102_s23 = smov [#allocation11]   ;;  %s320_s18 = int_to_ptr.hbm [resolvable:$true] %s319_s18 }
  0x1b   : > { %1609 = dma.hbm_to_vmem [thread:$0]  (!%p2219_p6), %s320_s18, 16, %s322_s21, [#allocation6]  }
  0x1c   : > { %s347_s24 = sshll.u32 %s2807_s3, 4  ;;  %s377_s1 = sshll.u32 %s2102_s23, 4  ;;  %s348_s24 = int_to_ptr.hbm [resolvable:$true] %s347_s24  ;;  %s378_s1 = int_to_ptr.vmem [resolvable:$true] %s377_s1 }
  0x1d   : > { %s375_s28 = sshll.u32 %s2809_s5, 4  ;;  %s2103_s26 = smov [#allocation7]   ;;  %s376_s28 = int_to_ptr.hbm [resolvable:$true] %s375_s28 }
  0x1e   : > { %1615 = dma.hbm_to_vmem [thread:$0]  (!%p2219_p6), %s348_s24, 128, %s350_s16, [#allocation9]  }
  0x1f   : > { %s333_s22 = sshll.u32 %s2810_s2, 4  ;;  %s335_s27 = sshll.u32 %s2103_s26, 4  ;;  %s334_s22 = int_to_ptr.hbm [resolvable:$true] %s333_s22  ;;  %s336_s27 = int_to_ptr.vmem [resolvable:$true] %s335_s27 }
  0x20   : > { %1621 = dma.hbm_to_vmem [thread:$0]  (!%p2219_p6), %s376_s28, 128, %s378_s1, [#allocation12]  }
  0x21   : > { %s2811_s4 = sld [smem:[#allocation29_spill]]  ;;  %s386_s16 = sshll.u32 %s2788_s6, 4  ;;  %s387_s16 = int_to_ptr.hbm [resolvable:$true] %s386_s16 }
  0x22   : > { %1612 = dma.hbm_to_vmem [thread:$0]  (!%p2219_p6), %s334_s22, 128, %s336_s27, [#allocation6]  }
  0x23   : > { %s2104_s1 = smov [#allocation10]   ;;  %s2105_s3 = smov [#allocation13]  }
  0x24   : > { %s363_s28 = sshll.u32 %s2104_s1, 4  ;;  %s388_s17 = sshll.u32 %s2105_s3, 4  ;;  %s364_s28 = int_to_ptr.vmem [resolvable:$true] %s363_s28  ;;  %s389_s17 = int_to_ptr.vmem [resolvable:$true] %s388_s17 }
  0x25   : > { %s2106_s20 = smov 64   ;;  %s2107_s22 = smov 4  }
  0x26   : > { %1624 = dma.hbm_to_vmem [thread:$0]  (!%p2219_p6), %s387_s16, 256, %s389_s17, [#allocation12], %s2106_s20, %s2106_s20, %s2107_s22  }
  0x27   : > { %s361_s18 = sshll.u32 %s2811_s4, 4  ;;  %s44_s23 = sadd.s32 1, %s2094_s13  ;;  %s362_s18 = int_to_ptr.hbm [resolvable:$true] %s361_s18 }
  0x28   : > { %1618 = dma.hbm_to_vmem [thread:$0]  (!%p2219_p6), %s362_s18, 128, %s364_s28, [#allocation9]  }
  0x29   : > { %s2792_s26 = sadd.s32 4294967294, %s2098_s14   ;;  %p46_p7 = scmp.ge.s32.totalorder %s44_s23, 2 }
  0x2a   : > { %s53_s27 = sadd.s32 1, %s2086_s11  ;;  %p60_p8 = scmp.ne.s32.totalorder %s2086_s11, %s2082_s10 }
  0x2b   : > { %s2830_s23 = smov (%p46_p7, %s44_s23), 0  ;;  %p61_p9 = scmp.eq.s32.totalorder %s2098_s14, 0 }
  0x2c   : > { %p66_p10 = scmp.ne.s32.totalorder %s2082_s10, %s2078_s30  ;;  %s48_s29 = ssub.s32 %s2094_s13, %s2830_s23 }
  0x2d   : > { %p238_p11 = scmp.eq.s32.totalorder %s2199_s15, 1  ;;  %p51_p12 = scmp.eq.s32.totalorder %s48_s29, 0 }
  0x2e   : > { %p2262_p13 = por %p67_p1, %p66_p10  ;;  %p244_p2 = scmp.eq.s32.totalorder %s2792_s26, 1 }
  0x2f   : > { %p2266_p0 = por %p238_p11, %p60_p8  ;;  %p62_p5 = por %p61_p9, %p60_p8 }
  0x30   : > { %s2273_s21 = scalar_select %p51_p12, %s2086_s11, %s53_s27  }
  0x31   : > { %p2275_p6 = por %p244_p2, %p66_p10  ;;  %s402_s16 = sand.u32 1, %s2086_s11  }
  0x32   : > { %s1537_s1 = sshll.u32 %s2094_s13, 3  ;;  %p1645_p7 = scmp.lt.s32.totalorder %s2098_s14, 2 }
  0x33   : > { %s1536_s28 = sshll.u32 %s402_s16, 3  ;;  %s2815_s0 = sld [smem:[#allocation25_spill]] }
  0x34   : > { %s406_s29 = scalar_lea.vmem [#allocation2], %s1536_s28  ;;  %p1626_p11 = pnand %p1645_p7, %p62_p5 }
  0x35   : > { %s415_s2 = sshll.u32 %s406_s29, 4  ;;  %s403_s27 = scalar_lea.sflag [#allocation3], %s402_s16  ;;  %s416_s2 = int_to_ptr.vmem [resolvable:$true] %s415_s2 }
  0x37   : > { %424 = sbr.rel (%p2207_p3) target bundleno = 915 (0x393), region = 48 }
  0x39   : > { %s411_s20 = scalar_lea.hbm %s2815_s0, %s1537_s1 }
  0x3a   : > { %s413_s22 = sshll.u32 %s411_s20, 4  ;;  %s414_s22 = int_to_ptr.hbm [resolvable:$true] %s413_s22 }
  0x3b   : > { %1628 = dma.hbm_to_vmem [thread:$0]  (!%p1626_p11), %s414_s22, 128, %s416_s2, %s403_s27  }
  0x3c   : > { %s2288_s26 = sand.u32 1, %s2082_s10  }
  0x3d   : > { %s1539_s4 = sshll.u32 %s2288_s26, 3  ;;  %s427_s3 = scalar_lea.sflag [#allocation3], %s2288_s26 }
  0x3e   : > { %s430_s1 = scalar_lea.vmem [#allocation2], %s1539_s4 }
  0x3f   : > { %2053 = dma.done.wait (%p2262_p13), %s427_s3, 128  }
  0x40   : > { %2055 = vsyncadd (%p2262_p13), %s427_s3, 4294967168 }
  0x41   : > { %2057 = dma.done.wait (%p67_p1), [#allocation6], 144  }
  0x42   : > { %2059 = vsyncadd (%p67_p1), [#allocation6], 4294967152 }
  0x43   : > { %2061 = dma.done.wait (%p67_p1), [#allocation9], 256  }
  0x44   : > { %2063 = vsyncadd (%p67_p1), [#allocation9], 4294967040 }
  0x45   : > { %2065 = dma.done.wait (%p67_p1), [#allocation12], 384  }
  0x46   : > { %2067 = vsyncadd (%p67_p1), [#allocation12], 4294966912  ;;  %vm509_vm0 = vcmask 261120   ;;  %v507_v0 = vld [vmem:[%s430_s1] sm:$0xff]  ;;  %v2108_v2 = vmov 32.0   ;;  %v1569_v15 = vld [vmem:[#allocation13] sm:$0xff] }
  0x47   : > { %v510_v1 = vsel %vm509_vm0, %v507_v0, 0.0  ;;  %1730 = vrcp.f32 %v2108_v2  ;;  %v1570_v14 = vld [vmem:[#allocation13 + $0x8] sm:$0xff]  ;;  %v1729_v25 = vld [vmem:[#allocation5] ss:$0 sm:$0xff]  ;;  %s2109_s2 = smov 104   ;;  %s2110_s4 = smov 112  }
  0x48   : > { %511 = vadd.xlane.f32.xlu0 %v510_v1  ;;  %569 = vmatpush.bf16.msra.mxu0 %v1570_v14  ;;  %s2111_s19 = smov 96   ;;  %s2112_s25 = smov 120   ;;  %v2113_v33 = vmov 1983009808   ;;  %vm587_vm5 = vcmask 1047556   ;;  %vm895_vm6 = vcmask 31744  }
  0x49   : > { %v592_v34 = vunpack.c.l.s4 %v2113_v33  ;;  %s2793_s16 = smov 64   ;;  %v2115_v46 = vmov 1934713408   ;;  %s2797_s28 = smov 4   ;;  %vm1116_vm7 = vcmask 60416  }
  0x4a   : > { %v616_v47 = vunpack.c.l.s4 %v2115_v46  ;;  %s2117_s17 = smov 124   ;;  %s2498_s20 = sshll.u32 %s2288_s26, 4 }
  0x4b   : > { %v2312_v38 = vunpack.c.0.s8 %v592_v34  ;;  %s2513_s22 = scalar_lea.vmem [#allocation17], %s2498_s20  ;;  %s2624_s29 = sshll.u32 %s2090_s12, 4 }
  0x4c   : > { %570 = vmatpush.bf16.msra.mxu0 %v1569_v15  ;;  %v2321_v53 = vunpack.c.0.s8 %v616_v47  ;;  %s1288_s3 = scalar_lea.hbm %s2790_s8, %s2624_s29  ;;  %s1307_s1 = sshll.u32 %s2513_s22, 4  ;;  %s2673_s1 = int_to_ptr.vmem [resolvable:$true] %s1307_s1 }
  0x4d   : > { %v1731_v3 = vpop.eup %1730  ;;  %s2654_s12 = sshll.u32 %s1288_s3, 4  ;;  %s1964_s3 = scalar_lea.hbm %s2790_s8, 32  ;;  %s1292_s12 = int_to_ptr.hbm [resolvable:$true] %s2654_s12 }
  0x4e   : > { %v514_v4 = vmul.f32 32.0, %v1731_v3  ;;  %vm518_vm1 = vweird.f32 %v1731_v3 }
  0x50   : > { %v515_v5 = vsub.f32 1.0, %v514_v4 }
  0x52   : > { %v516_v6 = vmul.f32 %v1731_v3, %v515_v5 }
  0x54   : > { %v517_v7 = vadd.f32 %v1731_v3, %v516_v6 }
  0x56   : > { %v519_v8 = vsel %vm518_vm1, %v1731_v3, %v517_v7 }
  0xbb   : > { %v512_v9 = vpop.xlane.xlu0 %511 }
  0xbc   : > { %v520_v10 = vmul.f32 %v519_v8, %v512_v9 }
  0xbe   : > { %v521_v11 = vsub.f32 %v507_v0, %v520_v10 }
  0xc0   : > { %v522_v12 = vmul.f32 %v521_v11, %v521_v11 }
  0xc2   : > { %v523_v13 = vsel %vm509_vm0, %v522_v12, 0.0 }
  0xc3   : > { %524 = vadd.xlane.f32.xlu0 %v523_v13 }
 0x136   : > { %v525_v16 = vpop.xlane.xlu0 %524 }
 0x137   : > { %v526_v17 = vmul.f32 %v525_v16, %v519_v8 }
 0x139   : > { %v527_v18 = vadd.f32 1e-05, %v526_v17 }
 0x13b   : > { %1732 = vrsqrt.f32 %v527_v18  ;;  %vm534_vm3 = vweird.f32 %v527_v18 }
 0x141   : > { %v1733_v19 = vpop.eup %1732 }
 0x142   : > { %v529_v20 = vmul.f32 %v1733_v19, %v527_v18  ;;  %vm535_vm2 = vweird.f32 %v1733_v19  ;;  %v2386_v18 = vld [vmem:[#allocation7] sm:$0xff] }
 0x143   : > { %vm536_vm4 = vmor %vm534_vm3, %vm535_vm2 }
 0x144   : > { %v530_v21 = vmul.f32 %v1733_v19, %v529_v20  ;;  %v786_v20 = vrot.slane %v2386_v18, 6 }
 0x146   : > { %v531_v22 = vmul.f32 0.5, %v530_v21 }
 0x148   : > { %v532_v23 = vsub.f32 1.5, %v531_v22 }
 0x14a   : > { %v533_v24 = vmul.f32 %v1733_v19, %v532_v23 }
 0x14c   : > { %v537_v26 = vsel %vm536_vm4, %v1733_v19, %v533_v24 }
 0x14d   : > { %v538_v27 = vmul.f32 %v537_v26, %v521_v11 }
 0x14f   : > { %v542_v28 = vmul.f32 %v1729_v25, %v538_v27  ;;  %v2394_v27 = vld [vmem:[#allocation8] sm:$0xff] }
 0x151   : > { %v543_v29 = vpack.c.bf16 %v542_v28, %v542_v28 }
 0x153   : > { %1557 = vmatmul.msk.bf16.vlgmr.msra.gmra.mxu0 %vm509_vm0, %v543_v29 }
 0x1d0   : > { %v572_v30 = vpop.f32.mrf.mxu0 }
 0x1d1   : > { %583 = vrot.lane.b32.xlu2 %v572_v30, %s2109_s2  ;;  %580 = vrot.lane.b32.xlu1 %v572_v30, %s2110_s4  ;;  %v589_v37 = vrot.slane %v572_v30, 4  ;;  %s1306_s4 = scalar_lea.hbm %s2791_s9, %s2624_s29 }
 0x1d2   : > { %s2659_s27 = sshll.u32 %s1306_s4, 4 }
 0x1d3   : > { %2816 = sst [smem:[#allocation24_spill]] %s2659_s27 }
 0x1d8   : > { %v574_v31 = vpop.f32.mrf.mxu0 }
 0x1d9   : > { %643 = vrot.lane.b32.xlu2 %v572_v30, %s2111_s19  ;;  %577 = vrot.lane.b32.xlu1 %v572_v30, %s2112_s25  ;;  %v782_v31 = vrot.slane %v2386_v18, 2  ;;  %s498_s25 = scalar_lea.vmem [#allocation15], %s2498_s20 }
 0x22b   : > { %v584_v32 = vpop.permute.xlu2 %583 }
 0x22c   : > { %649 = vrot.lane.b32.xlu2 %v584_v32, %s2111_s19  ;;  %v599_v43 = vrot.slane %v584_v32, 4 }
 0x233   : > { %v644_v11 = vpop.permute.xlu2 %643 }
 0x234   : > { %v657_v15 = vrot.slane %v644_v11, 4 }
 0x243   : > { %v581_v35 = vpop.permute.xlu1 %580 }
 0x244   : > { %647 = vrot.lane.b32.xlu1 %v581_v35, %s2111_s19  ;;  %v1724_v36 = vpack.i.bf16 %v584_v32, %v581_v35  ;;  %v590_v39 = vsel %vm587_vm5, %v581_v35, %v589_v37  ;;  %v586_v40 = vrot.slane %v581_v35, 4 }
 0x245   : > { %v598_v41 = vperm.slane %v590_v39, %v2312_v38 }
 0x246   : > { %1725 = vrot.lane.b32.xlu2 %v1724_v36, %s2793_s16  ;;  %v588_v48 = vsel %vm587_vm5, %v586_v40, %v572_v30 }
 0x247   : > { %v625_v51 = vrot.slane %v598_v41, 4  ;;  %v594_v54 = vperm.slane %v588_v48, %v2312_v38 }
 0x249   : > { %v613_v62 = vrot.slane %v594_v54, 4 }
 0x24b   : > { %v578_v42 = vpop.permute.xlu1 %577 }
 0x24c   : > { %v601_v44 = vrot.slane %v578_v42, 4  ;;  %645 = vrot.lane.b32.xlu0 %v578_v42, %s2111_s19  ;;  %v1719_v45 = vpack.i.bf16 %v578_v42, %v572_v30  ;;  %v600_v49 = vsel %vm587_vm5, %v599_v43, %v578_v42  ;;  %v821_v30 = vperm.slane %v786_v20, 0  ;;  %s1252_s19 = sand.u32 1, %s2199_s15  }
 0x24d   : > { %v606_v55 = vperm.slane %v600_v49, %v2312_v38  ;;  %v791_v20 = vrot.slane %v2394_v27, 2  ;;  %s2686_s4 = scalar_lea.sflag [#allocation16], %s1252_s19 }
 0x24e   : > { %v602_v50 = vsel %vm587_vm5, %v584_v32, %v601_v44  ;;  %1720 = vrot.lane.b32.xlu1 %v1719_v45, %s2793_s16  ;;  %s1958_s16 = sshra.s32 %s1292_s12, 4  ;;  %s1959_s16 = int_to_ptr.hbm [resolvable:$true] %s1958_s16 }
 0x24f   : > { %v610_v52 = vperm.slane %v602_v50, %v2312_v38  ;;  %v611_v61 = vrot.slane %v606_v55, 4  ;;  %v614_v63 = vsel %vm587_vm5, %v606_v55, %v613_v62  ;;  %s1960_s27 = scalar_lea.hbm %s1959_s16, 16  ;;  %p1965_p9 = scmp.lt.s32.totalorder %s1959_s16, %s2790_s8 }
 0x250   : > { %v2342_v1 = vperm.slane %v614_v63, %v2321_v53  ;;  %p1961_p1 = scmp.ne.s32.totalorder %s1959_s16, %s1960_s27  ;;  %p1966_p10 = scmp.lt.s32.totalorder %s1964_s3, %s1960_s27 }
 0x251   : > { %v626_v56 = vsel %vm587_vm5, %v610_v52, %v625_v51  ;;  %v623_v57 = vrot.slane %v610_v52, 4  ;;  %v612_v0 = vsel %vm587_vm5, %v611_v61, %v594_v54 }
 0x252   : > { %v2327_v58 = vperm.slane %v626_v56, %v2321_v53  ;;  %v2347_v2 = vperm.slane %v612_v0, %v2321_v53  ;;  %v637_v6 = vrot.slane %v2342_v1, 4  ;;  %p1962_p3 = pnand %p1961_p1, %p2266_p0  ;;  %p1967_p12 = por %p1966_p10, %p1965_p9 }
 0x253   : > { %v624_v59 = vsel %vm587_vm5, %v623_v57, %v598_v41  ;;  %v795_v41 = vrot.slane %v2394_v27, 6 }
 0x254   : > { %883 = vrot.lane.b32.xlu0 %v2327_v58, %s2797_s28  ;;  %v2333_v60 = vperm.slane %v624_v59, %v2321_v53  ;;  %v641_v3 = vrot.slane %v2327_v58, 4  ;;  %v635_v7 = vrot.slane %v2347_v2, 4  ;;  %v2372_v9 = vsel %vm587_vm5, 0.0, %v637_v6  ;;  %p1963_p8 = pneg %p1962_p3 }
 0x255   : > { %v910_v59 = vperm.slane %v795_v41, 0  ;;  %v837_v6 = vmul.f32 %v821_v30, %v2327_v58 }
 0x256   : > { %859 = vrot.lane.b32.xlu1 %v2327_v58, %s2117_s17  ;;  %855 = vrot.lane.b32.xlu2 %v2333_v60, %s2117_s17  ;;  %v2357_v4 = vsel %vm587_vm5, 0.0, %v641_v3  ;;  %v639_v5 = vrot.slane %v2333_v60, 4  ;;  %v2375_v10 = vsel %vm587_vm5, 0.0, %v635_v7  ;;  %p1968_p13 = pnand %p1967_p12, %p1963_p8 }
 0x258   : > { %v2367_v8 = vsel %vm587_vm5, 0.0, %v639_v5 }
 0x25c   : > { %851 = vrot.lane.b32.xlu0 %v2342_v1, %s2117_s17 }
 0x25e   : > { %847 = vrot.lane.b32.xlu1 %v2347_v2, %s2117_s17  ;;  %875 = vrot.lane.b32.xlu2 %v2342_v1, %s2797_s28 }
 0x264   : > { %871 = vrot.lane.b32.xlu0 %v2347_v2, %s2797_s28 }
 0x266   : > { %885 = vrot.lane.b32.xlu1 %v2357_v4, %s2797_s28  ;;  %861 = vrot.lane.b32.xlu2 %v2357_v4, %s2117_s17 }
 0x26c   : > { %857 = vrot.lane.b32.xlu0 %v2367_v8, %s2117_s17 }
 0x26e   : > { %853 = vrot.lane.b32.xlu1 %v2372_v9, %s2117_s17  ;;  %849 = vrot.lane.b32.xlu2 %v2375_v10, %s2117_s17 }
 0x274   : > { %877 = vrot.lane.b32.xlu0 %v2372_v9, %s2797_s28 }
 0x276   : > { %873 = vrot.lane.b32.xlu1 %v2375_v10, %s2797_s28 }
 0x286   : > { %v650_v12 = vpop.permute.xlu2 %649 }
 0x287   : > { %v667_v24 = vrot.slane %v650_v12, 4 }
 0x2a0   : > { %v1726_v16 = vpop.permute.xlu2 %1725 }
 0x2a1   : > { %v1728_v21 = vunpack.i.h.bf16 %v1726_v16  ;;  %v1727_v22 = vunpack.i.l.bf16 %v1726_v16 }
 0x2a3   : > { %v735_v32 = vrot.slane %v1728_v21, 4  ;;  %v723_v33 = vrot.slane %v1727_v22, 4 }
 0x2b0   : > { %v2411_v54 = vpop.permute.xlu2 %855 }
 0x2b6   : > { %v648_v13 = vpop.permute.xlu1 %647 }
 0x2b7   : > { %v655_v14 = vrot.slane %v648_v13, 4  ;;  %v658_v19 = vsel %vm587_vm5, %v648_v13, %v657_v15 }
 0x2b8   : > { %v2392_v25 = vperm.slane %v658_v19, %v2312_v38 }
 0x2b9   : > { %v656_v17 = vsel %vm587_vm5, %v655_v14, %v644_v11  ;;  %v817_v11 = vperm.slane %v782_v31, 0 }
 0x2ba   : > { %v662_v23 = vperm.slane %v656_v17, %v2312_v38  ;;  %v693_v42 = vrot.slane %v2392_v25, 4 }
 0x2bc   : > { %v681_v34 = vrot.slane %v662_v23, 4 }
 0x2be   : > { %v646_v26 = vpop.permute.xlu0 %645 }
 0x2bf   : > { %v668_v28 = vsel %vm587_vm5, %v667_v24, %v646_v26  ;;  %v669_v29 = vrot.slane %v646_v26, 4 }
 0x2c0   : > { %v674_v35 = vperm.slane %v668_v28, %v2312_v38  ;;  %v1721_v36 = vpop.permute.xlu1 %1720 }
 0x2c1   : > { %v670_v37 = vsel %vm587_vm5, %v650_v12, %v669_v29  ;;  %v1723_v39 = vunpack.i.h.bf16 %v1721_v36  ;;  %v1722_v40 = vunpack.i.l.bf16 %v1721_v36  ;;  %v906_v36 = vperm.slane %v791_v20, 0 }
 0x2c2   : > { %v678_v43 = vperm.slane %v670_v37, %v2312_v38  ;;  %v679_v44 = vrot.slane %v674_v35, 4  ;;  %v682_v45 = vsel %vm587_vm5, %v674_v35, %v681_v34 }
 0x2c3   : > { %v736_v46 = vsel %vm587_vm5, %v735_v32, %v1723_v39  ;;  %v737_v47 = vrot.slane %v1723_v39, 4  ;;  %v724_v48 = vsel %vm587_vm5, %v723_v33, %v1722_v40  ;;  %v725_v49 = vrot.slane %v1722_v40, 4 }
 0x2c4   : > { %v742_v50 = vperm.slane %v736_v46, %v2312_v38  ;;  %v730_v51 = vperm.slane %v724_v48, %v2312_v38  ;;  %v2409_v52 = vperm.slane %v682_v45, %v2321_v53  ;;  %v694_v57 = vsel %vm587_vm5, %v678_v43, %v693_v42 }
 0x2c5   : > { %v738_v55 = vsel %vm587_vm5, %v1728_v21, %v737_v47  ;;  %v726_v56 = vsel %vm587_vm5, %v1727_v22, %v725_v49  ;;  %v2421_v5 = vperm.slane %v694_v57, %v2321_v53  ;;  %v680_v7 = vsel %vm587_vm5, %v679_v44, %v662_v23 }
 0x2c6   : > { %v746_v61 = vperm.slane %v738_v55, %v2312_v38  ;;  %v747_v62 = vrot.slane %v742_v50, 4  ;;  %v734_v63 = vperm.slane %v726_v56, %v2312_v38  ;;  %v749_v0 = vrot.slane %v730_v51, 4  ;;  %996 = vrot.lane.b32.xlu2 %v2409_v52, %s2797_s28  ;;  %v884_v3 = vpop.permute.xlu0 %883 }
 0x2c7   : > { %1004 = vrot.lane.b32.xlu1 %v2421_v5, %s2797_s28  ;;  %980 = vrot.lane.b32.xlu0 %v2421_v5, %s2117_s17  ;;  %v691_v21 = vrot.slane %v678_v43, 4  ;;  %v2442_v32 = vperm.slane %v680_v7, %v2321_v53  ;;  %v833_v40 = vmul.f32 %v817_v11, %v2342_v1  ;;  %v876_v43 = vpop.permute.xlu2 %875 }
 0x2c8   : > { %v759_v12 = vrot.slane %v746_v61, 4  ;;  %v748_v13 = vsel %vm587_vm5, %v747_v62, %v730_v51  ;;  %v750_v14 = vsel %vm587_vm5, %v742_v50, %v749_v0  ;;  %v761_v15 = vrot.slane %v734_v63, 4  ;;  %v860_v16 = vpop.permute.xlu1 %859 }
 0x2c9   : > { %v754_v17 = vperm.slane %v748_v13, %v2321_v53  ;;  %v758_v19 = vperm.slane %v750_v14, %v2321_v53  ;;  %v902_v58 = vsel %vm895_vm6, %v860_v16, %v884_v3  ;;  %v692_v42 = vsel %vm587_vm5, %v691_v21, %v2392_v25 }
 0x2ca   : > { %v760_v22 = vsel %vm587_vm5, %v759_v12, %v734_v63  ;;  %v762_v23 = vsel %vm587_vm5, %v746_v61, %v761_v15  ;;  %v926_v24 = vmul.f32 %v910_v59, %v902_v58  ;;  %v705_v62 = vrot.slane %v2409_v52, 4 }
 0x2cb   : > { %v766_v26 = vperm.slane %v760_v22, %v2321_v53  ;;  %v770_v28 = vperm.slane %v762_v23, %v2321_v53  ;;  %v771_v29 = vrot.slane %v754_v17, 4  ;;  %v773_v30 = vrot.slane %v758_v19, 4 }
 0x2cc   : > { %v2439_v31 = vadd.f32 %v926_v24, %v837_v6  ;;  %v2470_v11 = vperm.slane %v692_v42, %v2321_v53  ;;  %v815_v12 = vperm.slane %v2386_v18, 0  ;;  %v904_v16 = vperm.slane %v2394_v27, 0 }
 0x2cd   : > { %v774_v33 = vsel %vm587_vm5, 0.0, %v773_v30  ;;  %v775_v34 = vrot.slane %v766_v26, 4  ;;  %v777_v35 = vrot.slane %v770_v28, 4  ;;  %v1185_v37 = vsel %vm587_vm5, %v773_v30, %v754_v17 }
 0x2ce   : > { %v1190_v39 = vrot.slane %v774_v33, 4  ;;  %968 = vrot.lane.b32.xlu2 %v2442_v32, %s2117_s17  ;;  %v852_v41 = vpop.permute.xlu0 %851  ;;  %v772_v44 = vsel %vm587_vm5, 0.0, %v771_v29  ;;  %v1189_v46 = vperm.slane %v1185_v37, %v2312_v38  ;;  %v2483_v23 = vsel %vm587_vm5, 0.0, %v705_v62 }
 0x2cf   : > { %v778_v45 = vsel %vm587_vm5, 0.0, %v777_v35  ;;  %v1196_v47 = vsel %vm587_vm5, %v777_v35, %v766_v26  ;;  %v898_v1 = vsel %vm895_vm6, %v852_v41, %v876_v43  ;;  %v776_v55 = vsel %vm587_vm5, 0.0, %v775_v34  ;;  %972 = vrot.lane.b32.xlu1 %v2409_v52, %s2117_s17  ;;  %992 = vrot.lane.b32.xlu0 %v2442_v32, %s2797_s28 }
 0x2d0   : > { %v1191_v48 = vsel %vm587_vm5, %v1190_v39, %v772_v44  ;;  %v1200_v49 = vperm.slane %v1196_v47, %v2312_v38  ;;  %v1201_v50 = vrot.slane %v778_v45, 4  ;;  %v848_v51 = vpop.permute.xlu1 %847  ;;  %v1209_v56 = vrot.slane %v1189_v46, 4 }
 0x2d1   : > { %v1195_v25 = vperm.slane %v1191_v48, %v2312_v38  ;;  %v922_v57 = vmul.f32 %v906_v36, %v898_v1  ;;  %v709_v30 = vrot.slane %v2421_v5, 4  ;;  %v831_v33 = vmul.f32 %v815_v12, %v2347_v2 }
 0x2d2   : > { %v1202_v59 = vsel %vm587_vm5, %v1201_v50, %v776_v55  ;;  %v1221_v61 = vrot.slane %v1200_v49, 4  ;;  %v703_v45 = vrot.slane %v2442_v32, 4  ;;  %v783_v1 = vrot.slane %v2386_v18, 3 }
 0x2d3   : > { %v1206_v63 = vperm.slane %v1202_v59, %v2312_v38  ;;  %v1207_v0 = vrot.slane %v1195_v25, 4  ;;  %v1210_v3 = vsel %vm587_vm5, %v1195_v25, %v1209_v56  ;;  %v930_v6 = vadd.f32 %v922_v57, %v833_v40 }
 0x2d4   : > { %v1218_v7 = vperm.slane %v1210_v3, %v2321_v53  ;;  %v2502_v44 = vsel %vm587_vm5, 0.0, %v709_v30  ;;  %v792_v25 = vrot.slane %v2394_v27, 3  ;;  %v781_v56 = vrot.slane %v2386_v18, 1 }
 0x2d5   : > { %v1208_v13 = vsel %vm587_vm5, %v1207_v0, %v1189_v46  ;;  %v1219_v14 = vrot.slane %v1206_v63, 4  ;;  %v1222_v15 = vsel %vm587_vm5, %v1206_v63, %v1221_v61  ;;  %v1056_v41 = vrot.slane %v930_v6, 4 }
 0x2d6   : > { %v1214_v17 = vperm.slane %v1208_v13, %v2321_v53  ;;  %v1230_v19 = vperm.slane %v1222_v15, %v2321_v53  ;;  %v1237_v58 = vrot.slane %v1218_v7, 4  ;;  %1000 = vrot.lane.b32.xlu2 %v2470_v11, %s2797_s28  ;;  %v872_v20 = vpop.permute.xlu0 %871  ;;  %v790_v57 = vrot.slane %v2394_v27, 1 }
 0x2d7   : > { %v1220_v21 = vsel %vm587_vm5, %v1219_v14, %v1200_v49  ;;  %v896_v22 = vsel %vm895_vm6, %v848_v51, %v872_v20  ;;  %976 = vrot.lane.b32.xlu1 %v2470_v11, %s2117_s17  ;;  %998 = vrot.lane.b32.xlu0 %v2483_v23, %s2797_s28  ;;  %v2506_v49 = vpop.permute.xlu2 %861  ;;  %v2521_v51 = vsel %vm587_vm5, 0.0, %v703_v45  ;;  %v818_v59 = vperm.slane %v783_v1, 0 }
 0x2d8   : > { %v1226_v24 = vperm.slane %v1220_v21, %v2321_v53  ;;  %v1233_v26 = vrot.slane %v1214_v17, 4  ;;  %v1235_v28 = vrot.slane %v1230_v19, 4  ;;  %v2486_v29 = vpop.permute.xlu1 %885  ;;  %v920_v34 = vmul.f32 %v904_v16, %v896_v22 }
 0x2d9   : > { %v1238_v39 = vsel %vm587_vm5, %v1230_v19, %v1237_v58  ;;  %v907_v61 = vperm.slane %v792_v25, 0  ;;  %v707_v62 = vrot.slane %v2470_v11, 4  ;;  %v816_v63 = vperm.slane %v781_v56, 0 }
 0x2da   : > { %v1231_v35 = vrot.slane %v1226_v24, 4  ;;  %v1234_v36 = vsel %vm587_vm5, %v1226_v24, %v1233_v26  ;;  %v1236_v37 = vsel %vm587_vm5, %v1235_v28, %v1218_v7  ;;  %v928_v2 = vadd.f32 %v920_v34, %v831_v33 }
 0x2db   : > { %v1240_v40 = vpack.c.bf16 %v1234_v36, %v1234_v36  ;;  %v1241_v43 = vpack.c.bf16 %v1236_v37, %v1236_v37  ;;  %v1242_v47 = vpack.c.bf16 %v1238_v39, %v1238_v39  ;;  %v905_v3 = vperm.slane %v790_v57, 0  ;;  %v2563_v37 = vld [vmem:[#allocation10] sm:$0xff] }
 0x2dc   : > { %v1232_v42 = vsel %vm587_vm5, %v1231_v35, %v1214_v17  ;;  %v1057_v48 = vsel %vm587_vm5, %v1056_v41, %v928_v2  ;;  %v834_v7 = vmul.f32 %v818_v59, %v2372_v9  ;;  %v2540_v14 = vsel %vm587_vm5, 0.0, %v707_v62  ;;  %v2565_v41 = vld [vmem:[#allocation11] sm:$0xff] }
 0x2dd   : > { %v1239_v46 = vpack.c.bf16 %v1232_v42, %v1232_v42  ;;  %1244 = vst.msk [vmem:[%s2513_s22 + $0x4] sm:$0xf] %vm1116_vm7, %v1240_v40  ;;  %v832_v17 = vmul.f32 %v816_v63, %v2375_v10  ;;  %v1061_v9 = vperm.slane %v1057_v48, %v2312_v38  ;;  %v800_v2 = vrot.slane %v2563_v37, 2 }
 0x2de   : > { %1006 = vrot.lane.b32.xlu2 %v2502_v44, %s2797_s28  ;;  %v2510_v50 = vpop.permute.xlu0 %857  ;;  %1245 = vst.msk [vmem:[%s2513_s22 + $0x8] sm:$0xf] %vm1116_vm7, %v1241_v43  ;;  %v809_v42 = vrot.slane %v2565_v41, 2  ;;  %v804_v43 = vrot.slane %v2563_v37, 6  ;;  %v813_v45 = vrot.slane %v2565_v41, 6  ;;  %v1024_v1 = vperm.slane %v2565_v41, 0 }
 0x2df   : > { %1243 = vst.msk [vmem:[%s2513_s22] sm:$0xf] %vm1116_vm7, %v1239_v46  ;;  %982 = vrot.lane.b32.xlu1 %v2502_v44, %s2117_s17  ;;  %970 = vrot.lane.b32.xlu0 %v2521_v51, %s2117_s17  ;;  %v850_v12 = vpop.permute.xlu2 %849  ;;  %v1082_v24 = vrot.slane %v1061_v9, 4  ;;  %v936_v57 = vperm.slane %v2563_v37, 0 }
 0x2e0   : > { %v854_v55 = vpop.permute.xlu1 %853  ;;  %1246 = vst.msk [vmem:[%s2513_s22 + $0xc] sm:$0xf] %vm1116_vm7, %v1242_v47  ;;  %v938_v47 = vperm.slane %v800_v2, 0  ;;  %v1026_v48 = vperm.slane %v809_v42, 0  ;;  %v1030_v25 = vperm.slane %v813_v45, 0  ;;  %v801_v2 = vrot.slane %v2563_v37, 3 }
 0x2e1   : > { %v796_v42 = vrot.slane %v2394_v27, 7 }
 0x2e6   : > { %974 = vrot.lane.b32.xlu2 %v2483_v23, %s2117_s17  ;;  %v878_v0 = vpop.permute.xlu0 %877 }
 0x2e7   : > { %v899_v6 = vsel %vm895_vm6, %v854_v55, %v878_v0  ;;  %994 = vrot.lane.b32.xlu1 %v2521_v51, %s2797_s28  ;;  %1002 = vrot.lane.b32.xlu0 %v2540_v14, %s2797_s28  ;;  %v942_v55 = vperm.slane %v804_v43, 0  ;;  %v802_v0 = vrot.slane %v2563_v37, 4  ;;  %v805_v43 = vrot.slane %v2563_v37, 7 }
 0x2e8   : > { %v923_v13 = vmul.f32 %v907_v61, %v899_v6  ;;  %v874_v15 = vpop.permute.xlu1 %873 }
 0x2e9   : > { %v897_v16 = vsel %vm895_vm6, %v850_v12, %v874_v15  ;;  %v811_v12 = vrot.slane %v2565_v41, 4 }
 0x2ea   : > { %v931_v19 = vadd.f32 %v923_v13, %v834_v7  ;;  %v921_v58 = vmul.f32 %v905_v3, %v897_v16  ;;  %v954_v3 = vmul.f32 %v938_v47, %v2409_v52  ;;  %v952_v16 = vmul.f32 %v936_v57, %v2442_v32 }
 0x2eb   : > { %v787_v47 = vrot.slane %v2386_v18, 7  ;;  %v939_v57 = vperm.slane %v801_v2, 0 }
 0x2ec   : > { %v1062_v20 = vrot.slane %v931_v19, 4  ;;  %v929_v21 = vadd.f32 %v921_v58, %v832_v17  ;;  %v940_v17 = vperm.slane %v802_v0, 0  ;;  %v958_v19 = vmul.f32 %v942_v55, %v2421_v5 }
 0x2ed   : > { %v814_v5 = vrot.slane %v2565_v41, 7  ;;  %v943_v0 = vperm.slane %v805_v43, 0 }
 0x2ee   : > { %v1063_v22 = vsel %vm587_vm5, %v1062_v20, %v929_v21  ;;  %978 = vrot.lane.b32.xlu2 %v2540_v14, %s2117_s17  ;;  %v1028_v20 = vperm.slane %v811_v12, 0  ;;  %s1289_s17 = sshll.u32 %s498_s25, 4  ;;  %s2667_s17 = int_to_ptr.vmem [resolvable:$true] %s1289_s17 }
 0x2ef   : > { %v1067_v26 = vperm.slane %v1063_v22, %v2312_v38  ;;  %879 = vrot.lane.b32.xlu1 %v2333_v60, %s2797_s28  ;;  %v1031_v55 = vperm.slane %v814_v5, 0 }
 0x2f1   : > { %v1080_v28 = vrot.slane %v1067_v26, 4  ;;  %v2554_v30 = vsel %vm587_vm5, %v1067_v26, %v1082_v24 }
 0x2f3   : > { %v2559_v10 = vsel %vm587_vm5, %v1080_v28, %v1061_v9 }
 0x2f6   : > { %881 = vrot.lane.b32.xlu2 %v2367_v8, %s2797_s28 }
 0x320   : > { %v997_v33 = vpop.permute.xlu2 %996 }
 0x328   : > { %v969_v34 = vpop.permute.xlu2 %968 }
 0x330   : > { %v1001_v35 = vpop.permute.xlu2 %1000 }
 0x338   : > { %v1007_v36 = vpop.permute.xlu2 %1006 }
 0x339   : > { %v1005_v39 = vpop.permute.xlu1 %1004  ;;  %v981_v40 = vpop.permute.xlu0 %980 }
 0x33a   : > { %v1022_v61 = vsel %vm895_vm6, %v981_v40, %v1005_v39  ;;  %v810_v39 = vrot.slane %v2565_v41, 3 }
 0x33b   : > { %v1046_v13 = vmul.f32 %v1030_v25, %v1022_v61  ;;  %v803_v61 = vrot.slane %v2563_v37, 5 }
 0x33d   : > { %v1054_v22 = vadd.f32 %v1046_v13, %v958_v19  ;;  %v822_v13 = vperm.slane %v787_v47, 0 }
 0x33f   : > { %v1133_v32 = vrot.slane %v1054_v22, 4 }
 0x340   : > { %v975_v46 = vpop.permute.xlu2 %974 }
 0x341   : > { %v973_v56 = vpop.permute.xlu1 %972  ;;  %v993_v59 = vpop.permute.xlu0 %992 }
 0x342   : > { %v1018_v62 = vsel %vm895_vm6, %v973_v56, %v997_v33  ;;  %v1016_v63 = vsel %vm895_vm6, %v969_v34, %v993_v59  ;;  %v956_v33 = vmul.f32 %v940_v17, %v2470_v11  ;;  %v785_v11 = vrot.slane %v2386_v18, 5 }
 0x343   : > { %v1042_v6 = vmul.f32 %v1026_v48, %v1018_v62  ;;  %v1040_v7 = vmul.f32 %v1024_v1, %v1016_v63  ;;  %v794_v1 = vrot.slane %v2394_v27, 5  ;;  %v799_v59 = vrot.slane %v2563_v37, 1 }
 0x344   : > { %v911_v63 = vperm.slane %v796_v42, 0  ;;  %v955_v37 = vmul.f32 %v939_v57, %v2483_v23  ;;  %v793_v42 = vrot.slane %v2394_v27, 4 }
 0x345   : > { %v1050_v15 = vadd.f32 %v1042_v6, %v954_v3  ;;  %v1048_v9 = vadd.f32 %v1040_v7, %v952_v16  ;;  %v808_v6 = vrot.slane %v2565_v41, 1  ;;  %v812_v7 = vrot.slane %v2565_v41, 5 }
 0x346   : > { %v909_v16 = vperm.slane %v794_v1, 0  ;;  %v937_v19 = vperm.slane %v799_v59, 0 }
 0x347   : > { %v1121_v58 = vrot.slane %v1050_v15, 4  ;;  %v820_v15 = vperm.slane %v785_v11, 0  ;;  %v1025_v41 = vperm.slane %v808_v6, 0  ;;  %v1029_v22 = vperm.slane %v812_v7, 0 }
 0x348   : > { %v979_v21 = vpop.permute.xlu2 %978 }
 0x349   : > { %v1122_v24 = vsel %vm587_vm5, %v1121_v58, %v1048_v9  ;;  %v977_v26 = vpop.permute.xlu1 %976  ;;  %v999_v52 = vpop.permute.xlu0 %998 }
 0x34a   : > { %v1020_v28 = vsel %vm895_vm6, %v977_v26, %v1001_v35  ;;  %v1027_v35 = vperm.slane %v810_v39, 0  ;;  %v1019_v48 = vsel %vm895_vm6, %v975_v46, %v999_v52  ;;  %v903_v46 = vsel %vm895_vm6, %v2506_v49, %v2486_v29 }
 0x34b   : > { %v1044_v34 = vmul.f32 %v1028_v20, %v1020_v28  ;;  %v927_v9 = vmul.f32 %v911_v63, %v903_v46  ;;  %v959_v20 = vmul.f32 %v943_v0, %v2502_v44  ;;  %v784_v29 = vrot.slane %v2386_v18, 4 }
 0x34c   : > { %v1043_v12 = vmul.f32 %v1027_v35, %v1019_v48  ;;  %v838_v49 = vmul.f32 %v822_v13, %v2357_v4  ;;  %v836_v52 = vmul.f32 %v820_v15, %v2367_v8  ;;  %v953_v39 = vmul.f32 %v937_v19, %v2521_v51 }
 0x34d   : > { %v1052_v40 = vadd.f32 %v1044_v34, %v956_v33  ;;  %v1126_v5 = vperm.slane %v1122_v24, %v2312_v38 }
 0x34e   : > { %v1051_v26 = vadd.f32 %v1043_v12, %v955_v37 }
 0x34f   : > { %v1134_v45 = vsel %vm587_vm5, %v1133_v32, %v1052_v40  ;;  %v935_v40 = vadd.f32 %v927_v9, %v838_v49  ;;  %v1147_v48 = vrot.slane %v1126_v5, 4 }
 0x350   : > { %v882_v3 = vpop.permute.xlu2 %881  ;;  %v1138_v4 = vperm.slane %v1134_v45, %v2312_v38  ;;  %v1127_v8 = vrot.slane %v1051_v26, 4 }
 0x351   : > { %v983_v25 = vpop.permute.xlu1 %982  ;;  %v971_v56 = vpop.permute.xlu0 %970  ;;  %v901_v58 = vsel %vm895_vm6, %v2510_v50, %v882_v3  ;;  %v1074_v11 = vrot.slane %v935_v40, 4 }
 0x352   : > { %v1023_v62 = vsel %vm895_vm6, %v983_v25, %v1007_v36  ;;  %v941_v36 = vperm.slane %v803_v61, 0  ;;  %v925_v28 = vmul.f32 %v909_v16, %v901_v58  ;;  %v1159_v24 = vrot.slane %v1138_v4, 4 }
 0x353   : > { %v1047_v17 = vmul.f32 %v1031_v55, %v1023_v62  ;;  %v908_v25 = vperm.slane %v793_v42, 0 }
 0x354   : > { %v957_v50 = vmul.f32 %v941_v36, %v2540_v14  ;;  %v933_v43 = vadd.f32 %v925_v28, %v836_v52  ;;  %v819_v14 = vperm.slane %v784_v29, 0 }
 0x355   : > { %v1055_v33 = vadd.f32 %v1047_v17, %v959_v20  ;;  %v2650_v20 = vperm.slane %v2559_v10, %v2321_v53  ;;  %v1091_v10 = vperm.slane %v2554_v30, %v2321_v53 }
 0x356   : > { %v1075_v27 = vsel %vm587_vm5, %v1074_v11, %v933_v43  ;;  %v835_v3 = vmul.f32 %v819_v14, %v2333_v60  ;;  %v1068_v60 = vrot.slane %v2439_v31, 4 }
 0x357   : > { %v1139_v47 = vrot.slane %v1055_v33, 4  ;;  %v1079_v7 = vperm.slane %v1075_v27, %v2312_v38 }
 0x359   : > { %v995_v23 = vpop.permute.xlu1 %994  ;;  %v1003_v34 = vpop.permute.xlu0 %1002  ;;  %v1092_v26 = vrot.slane %v1079_v7, 4 }
 0x35a   : > { %v1017_v32 = vsel %vm895_vm6, %v971_v56, %v995_v23  ;;  %v1021_v44 = vsel %vm895_vm6, %v979_v21, %v1003_v34 }
 0x35b   : > { %v1041_v18 = vmul.f32 %v1025_v41, %v1017_v32  ;;  %v1045_v2 = vmul.f32 %v1029_v22, %v1021_v44 }
 0x35d   : > { %v1049_v35 = vadd.f32 %v1041_v18, %v953_v39  ;;  %v1053_v51 = vadd.f32 %v1045_v2, %v957_v50  ;;  %v1110_v50 = vrot.slane %v1091_v10, 4 }
 0x35f   : > { %v1128_v21 = vsel %vm587_vm5, %v1127_v8, %v1049_v35  ;;  %v1140_v1 = vsel %vm587_vm5, %v1139_v47, %v1053_v51 }
 0x360   : > { %v1132_v55 = vperm.slane %v1128_v21, %v2312_v38  ;;  %v1144_v45 = vperm.slane %v1140_v1, %v2312_v38 }
 0x361   : > { %v880_v56 = vpop.permute.xlu1 %879 }
 0x362   : > { %v1145_v57 = vrot.slane %v1132_v55, 4  ;;  %v1148_v59 = vsel %vm587_vm5, %v1132_v55, %v1147_v48  ;;  %v1157_v61 = vrot.slane %v1144_v45, 4  ;;  %v1160_v62 = vsel %vm587_vm5, %v1144_v45, %v1159_v24 }
 0x363   : > { %v1156_v63 = vperm.slane %v1148_v59, %v2321_v53  ;;  %v1168_v0 = vperm.slane %v1160_v62, %v2321_v53  ;;  %v900_v6 = vsel %vm895_vm6, %v2411_v54, %v880_v56 }
 0x364   : > { %v1146_v46 = vsel %vm587_vm5, %v1145_v57, %v1126_v5  ;;  %v1158_v12 = vsel %vm587_vm5, %v1157_v61, %v1138_v4  ;;  %v924_v13 = vmul.f32 %v908_v25, %v900_v6 }
 0x365   : > { %v1152_v15 = vperm.slane %v1146_v46, %v2321_v53  ;;  %v1175_v16 = vrot.slane %v1156_v63, 4  ;;  %v1164_v17 = vperm.slane %v1158_v12, %v2321_v53  ;;  %v1173_v37 = vrot.slane %v1168_v0, 4 }
 0x366   : > { %v932_v54 = vadd.f32 %v924_v13, %v835_v3 }
 0x367   : > { %v1171_v19 = vrot.slane %v1152_v15, 4  ;;  %v1169_v36 = vrot.slane %v1164_v17, 4  ;;  %v1174_v58 = vsel %vm587_vm5, %v1173_v37, %v1156_v63  ;;  %v1176_v9 = vsel %vm587_vm5, %v1168_v0, %v1175_v16 }
 0x368   : > { %v1179_v41 = vpack.c.bf16 %v1174_v58, %v1174_v58  ;;  %v1180_v22 = vpack.c.bf16 %v1176_v9, %v1176_v9  ;;  %v1069_v31 = vsel %vm587_vm5, %v1068_v60, %v932_v54 }
 0x369   : > { %v1170_v29 = vsel %vm587_vm5, %v1169_v36, %v1152_v15  ;;  %v1172_v49 = vsel %vm587_vm5, %v1164_v17, %v1171_v19  ;;  %v1073_v52 = vperm.slane %v1069_v31, %v2312_v38  ;;  %v1106_v38 = vrot.slane %v2650_v20, 4 }
 0x36a   : > { %v1177_v28 = vpack.c.bf16 %v1170_v29, %v1170_v29  ;;  %v1178_v33 = vpack.c.bf16 %v1172_v49, %v1172_v49  ;;  %1183 = vst.msk [vmem:[%s498_s25 + $0x8] sm:$0xf] %vm1116_vm7, %v1179_v41 }
 0x36b   : > { %v1093_v23 = vsel %vm587_vm5, %v1092_v26, %v1073_v52  ;;  %v1094_v34 = vrot.slane %v1073_v52, 4  ;;  %1184 = vst.msk [vmem:[%s498_s25 + $0xc] sm:$0xf] %vm1116_vm7, %v1180_v22 }
 0x36c   : > { %v1099_v39 = vperm.slane %v1093_v23, %v2321_v53  ;;  %1181 = vst.msk [vmem:[%s498_s25] sm:$0xf] %vm1116_vm7, %v1177_v28 }
 0x36d   : > { %v1095_v30 = vsel %vm587_vm5, %v1079_v7, %v1094_v34  ;;  %1182 = vst.msk [vmem:[%s498_s25 + $0x4] sm:$0xf] %vm1116_vm7, %v1178_v33 }
 0x36e   : > { %v1103_v32 = vperm.slane %v1095_v30, %v2321_v53  ;;  %v1104_v44 = vrot.slane %v1099_v39, 4  ;;  %v1107_v40 = vsel %vm587_vm5, %v1099_v39, %v1106_v38 }
 0x36f   : > { %1971 = shalt.err (!%p1968_p13)
}
 0x370   : > { %s2817_s15 = smov 4   ;;  %s2818_s19 = smov 64   ;;  %v1113_v53 = vpack.c.bf16 %v1107_v40, %v1107_v40 }
 0x371   : > { %s2819_s0 = sld [smem:[#allocation24_spill]]  ;;  %s1992_s22 = scalar_lea.hbm %s2791_s9, 32 }
 0x372   : > { %1601 = dma.vmem_to_hbm [thread:$0]  (%p2266_p0), %s2667_s17, 256, %s1292_s12, %s2686_s4, %s2818_s19, %s2818_s19, %s2817_s15  }
 0x377   : > { %s2820_s25 = int_to_ptr.hbm [resolvable:$true] %s2819_s0 }
 0x378   : > { %s1986_s28 = sshra.s32 %s2820_s25, 4  ;;  %s1987_s28 = int_to_ptr.hbm [resolvable:$true] %s1986_s28 }
 0x379   : > { %s1988_s16 = scalar_lea.hbm %s1987_s28, 16  ;;  %p1993_p11 = scmp.lt.s32.totalorder %s1987_s28, %s2791_s9 }
 0x37a   : > { %p1989_p2 = scmp.ne.s32.totalorder %s1987_s28, %s1988_s16  ;;  %p1994_p1 = scmp.lt.s32.totalorder %s1992_s22, %s1988_s16 }
 0x37c   : > { %p1990_p5 = pnand %p1989_p2, %p2266_p0  ;;  %p1995_p3 = por %p1994_p1, %p1993_p11 }
 0x37e   : > { %p1991_p7 = pneg %p1990_p5 }
 0x380   : > { %p1996_p8 = pnand %p1995_p3, %p1991_p7 }
 0x382   : > { %1999 = shalt.err (!%p1996_p8)
}
 0x383   : > { %s2821_s17 = smov %s2820_s25  ;;  %v1105_v5 = vsel %vm587_vm5, %v1104_v44, %v2650_v20  ;;  %v1108_v18 = vrot.slane %v1103_v32, 4  ;;  %v1111_v2 = vsel %vm587_vm5, %v1103_v32, %v1110_v50  ;;  %s491_s5 = scalar_lea.vmem [#allocation14], %s2498_s20 }
 0x384   : > { %1602 = dma.vmem_to_hbm [thread:$0]  (%p2266_p0), %s2673_s1, 256, %s2821_s17, %s2686_s4, %s2818_s19, %s2818_s19, %s2817_s15   ;;  %v1112_v4 = vpack.c.bf16 %v1105_v5, %v1105_v5  ;;  %v1115_v8 = vpack.c.bf16 %v1111_v2, %v1111_v2 }
 0x385   : > { %s1271_s12 = sshll.u32 %s491_s5, 4  ;;  %s2822_s16 = scalar_lea.hbm %s2789_s7, %s2624_s29  ;;  %1118 = vst.msk [vmem:[%s491_s5 + $0x4] sm:$0xf] %vm1116_vm7, %v1113_v53  ;;  %v1109_v42 = vsel %vm587_vm5, %v1108_v18, %v1091_v10  ;;  %s1272_s12 = int_to_ptr.vmem [resolvable:$true] %s1271_s12 }
 0x386   : > { %s2735_s27 = sshll.u32 %s2822_s16, 4  ;;  %v1114_v43 = vpack.c.bf16 %v1109_v42, %v1109_v42  ;;  %1117 = vst.msk [vmem:[%s491_s5] sm:$0xf] %vm1116_vm7, %v1112_v4  ;;  %s1248_s0 = scalar_lea.sflag [#allocation4], %s2288_s26  ;;  %s1274_s27 = int_to_ptr.hbm [resolvable:$true] %s2735_s27 }
 0x387   : > { %1120 = vst.msk [vmem:[%s491_s5 + $0xc] sm:$0xf] %vm1116_vm7, %v1115_v8  ;;  %s2014_s20 = sshra.s32 %s1274_s27, 4  ;;  %s2020_s2 = scalar_lea.hbm %s2789_s7, 32  ;;  %s2015_s20 = int_to_ptr.hbm [resolvable:$true] %s2014_s20 }
 0x388   : > { %1119 = vst.msk [vmem:[%s491_s5 + $0x8] sm:$0xf] %vm1116_vm7, %v1114_v43  ;;  %s2016_s29 = scalar_lea.hbm %s2015_s20, 16  ;;  %p2021_p13 = scmp.lt.s32.totalorder %s2015_s20, %s2789_s7 }
 0x389   : > { %p2017_p9 = scmp.ne.s32.totalorder %s2015_s20, %s2016_s29  ;;  %p2022_p2 = scmp.lt.s32.totalorder %s2020_s2, %s2016_s29 }
 0x38b   : > { %p2018_p10 = pnand %p2017_p9, %p2266_p0  ;;  %p2023_p5 = por %p2022_p2, %p2021_p13 }
 0x38d   : > { %p2019_p12 = pneg %p2018_p10 }
 0x38f   : > { %p2024_p7 = pnand %p2023_p5, %p2019_p12 }
 0x391   : > { %2027 = shalt.err (!%p2024_p7)
}
 0x392   : > { %1600 = dma.vmem_to_hbm [thread:$0]  (%p2266_p0), %s1272_s12, 256, %s1274_s27, %s1248_s0, %s2818_s19, %s2818_s19, %s2817_s15  }
 0x393 PF: > { %s1324_s26 = sand.u32 1, %s2078_s30   ;;  %p1630_p11 = pnand %p1535_p4, %p2275_p6 }
 0x394   : > { %s1325_s17 = scalar_lea.sflag [#allocation4], %s1324_s26 }
 0x395   : > { %p1631_p1 = pneg %p1630_p11 }
 0x397   : > { %2069 = dma.done.wait (%p1631_p1), %s1325_s17, 256  }
 0x398   : > { %2071 = vsyncadd (%p1631_p1), %s1325_s17, 4294967040  ;;  %s2823_s5 = sadd.s32 4294967294, %s2098_s14  }
 0x399   : > { %s1334_s25 = sand.u32 1, %s2823_s5  }
 0x39a   : > { %s1335_s18 = scalar_lea.sflag [#allocation16], %s1334_s25 }
 0x39b   : > { %2073 = dma.done.wait (%p1631_p1), %s1335_s18, 512  }
 0x39c   : > { %2075 = vsyncadd (%p1631_p1), %s1335_s18, 4294966784  ;;  %s32_s14 = sadd.s32 1, %s2098_s14   ;;  %s2824_s30 = smov %s2082_s10 }
 0x39d   : > { %p29_p0 = scmp.ge.s32.totalorder %s32_s14, 4   ;;  %s2825_s10 = smov %s2086_s11 }
 0x39e   : > { %s2826_s11 = smov %s2273_s21  ;;  %s2827_s12 = smov %s2094_s13 }
 0x39f   : > { %s2828_s13 = smov %s2830_s23  ;;  %31 = sbr.rel (!%p29_p0) target bundleno = 18 (0x12), region = 153 }
 0x3a4   :  { %1351 = vsyncpa [#allocation3], 1 }
 0x3a5   :  { %1353 = vsyncpa [#allocation3 + $0x1], 1 }
 0x3a6   :  { %1354 = vsyncpa [#allocation6], 1 }
 0x3a7   :  { %1355 = vsyncpa [#allocation9], 1 }
 0x3a8   :  { %1356 = vsyncpa [#allocation12], 1 }
 0x3a9   :  { %1357 = vsyncpa [#allocation4], 1 }
 0x3aa   :  { %1359 = vsyncpa [#allocation4 + $0x1], 1 }
 0x3ab   :  { %1360 = vsyncpa [#allocation16], 1 }
 0x3ac   :  { %1362 = vsyncpa [#allocation16 + $0x1], 1 }

</bundles_post_ra>
